<compile_context>
chip_gen: v7x
topology: tpu7x:2x2x1
jax: 0.10.0
libtpu: 0.0.40
codegen_flags: <defaults>
</compile_context>

<pallas_src>
import jax
import jax.numpy as jnp
from jax.experimental import pallas as pl
from jax.experimental.pallas import tpu as pltpu

LN_EPS = 1e-5


def _round_up(x, m):
    return (x + m - 1) // m * m


def _bf16_tanh_default():
    """bf16 tanh uses the bf16 EUP path on v6e/v7x; keep f32 on v2-v5 generations."""
    try:
        kind = jax.devices()[0].device_kind.lower()
    except Exception:
        return True
    return not any(g in kind for g in ("v2", "v3", "v4", "v5"))


def _pick_batch_block(batch, tile_b):
    """tile_b rows per step for large batches; for small batches split into two grid steps
    (bf16-sublane-aligned) when possible so both v7x TensorCores get work."""
    if batch > tile_b:
        return tile_b
    if batch >= 32 and batch % 32 == 0:
        return batch // 2
    return batch


def make_latent_critic_kernel(feat, tanh_in_bf16):
    """feat: real (unpadded) feature_dim used for LayerNorm statistics."""

    def kernel(obs_ref, act_ref, tw_ref, w1h_ref, w1a_ref,
               q1w2_ref, q2w2_ref, w3_ref, bias_ref, q_out_ref):
        feat_pad = tw_ref.shape[1]
        hid_pad = q1w2_ref.shape[0]

        # Packed (8, W) f32 bias bundle: one DMA instead of seven tiny ones.
        bias = bias_ref[...]
        t_b = bias[0:1, :feat_pad]        # trunk Linear bias
        lnw = bias[1:2, :feat_pad]        # LayerNorm weight
        lnb = bias[2:3, :feat_pad]        # LayerNorm bias
        b1 = bias[3:4, :2 * hid_pad]      # fused twin-head layer-1 bias
        b2a = bias[4:5, :hid_pad]         # Q1 layer-2 bias
        b2b = bias[5:6, :hid_pad]         # Q2 layer-2 bias
        b3 = bias[6:7, :2]                # (q1, q2) final biases

        # f32 activations straight from HBM; cast to bf16 on the VPU (no wrapper-side pass).
        obs = obs_ref[...].astype(jnp.bfloat16)     # (TB, OB)
        act = act_ref[...].astype(jnp.bfloat16)     # (TB, ACT)

        # ---- trunk: Linear -> LayerNorm -> Tanh -------------------------------------------
        h = jnp.dot(obs, tw_ref[...], preferred_element_type=jnp.float32) + t_b
        inv_feat = 1.0 / feat
        mu = jnp.sum(h, axis=-1, keepdims=True) * inv_feat     # padded lanes of h are exactly 0
        d = h - mu
        if feat < feat_pad:
            lane = jax.lax.broadcasted_iota(jnp.int32, h.shape, 1)
            d = jnp.where(lane < feat, d, 0.0)
        var = jnp.sum(d * d, axis=-1, keepdims=True) * inv_feat   # two-pass (stable) variance
        hn = d * jax.lax.rsqrt(var + LN_EPS) * lnw + lnb           # padded lanes stay 0
        if tanh_in_bf16:
            h_bf = jnp.tanh(hn.astype(jnp.bfloat16))               # bf16 EUP path (v6e/v7x)
        else:
            h_bf = jnp.tanh(hn).astype(jnp.bfloat16)

        # ---- fused twin-head layer-1: concat([h, act]) @ [W1_q1 | W1_q2] --------------------
        # Chained accumulation so the second matmul can accumulate in place (v7x MRB).
        x = jnp.dot(h_bf, w1h_ref[...], preferred_element_type=jnp.float32)
        x = x + jnp.dot(act, w1a_ref[...], preferred_element_type=jnp.float32)
        x = x + b1
        x = jnp.maximum(x, 0.0)                                    # (TB, 2*HID_PAD) f32

        # hid_pad is a multiple of 128 -> lane-aligned, free views.
        x1 = x[:, :hid_pad].astype(jnp.bfloat16)
        x2 = x[:, hid_pad:].astype(jnp.bfloat16)

        # ---- per-head layer-2 ----------------------------------------------------------------
        y1 = jnp.maximum(
            jnp.dot(x1, q1w2_ref[...], preferred_element_type=jnp.float32) + b2a, 0.0)
        y2 = jnp.maximum(
            jnp.dot(x2, q2w2_ref[...], preferred_element_type=jnp.float32) + b2b, 0.0)

        # ---- final N=1 layer on VPU + lane reduce (skip the MXU), fused (TB, 2) store --------
        w3 = w3_ref[...]                                           # (2, HID_PAD) f32
        q1 = jnp.sum(y1 * w3[0:1, :], axis=-1, keepdims=True)
        q2 = jnp.sum(y2 * w3[1:2, :], axis=-1, keepdims=True)
        q_out_ref[...] = jnp.concatenate([q1, q2], axis=-1) + b3

    return kernel


def latent_critic_forward(obs, action, params, *, tile_b=256,
                          single_buffer_weights=False, tanh_in_bf16=None):
    """Returns (q1, q2), each (B, 1) float32.

    tile_b: batch rows per grid step. 256 fills the 256-wide MXU on v6e/v7x; prefer 128 on v5e.
    single_buffer_weights: set True on v7x at production HID so the constant-index weight
        blocks are not double-buffered (halves weight VMEM residency).
    """
    if tanh_in_bf16 is None:
        tanh_in_bf16 = _bf16_tanh_default()

    tw, w1h, w1a = params["tw"], params["w1h"], params["w1a"]
    q1w2, q2w2, w3, bias = params["q1w2"], params["q2w2"], params["w3"], params["bias"]
    feat = params["feature_dim"]

    B, OB = obs.shape
    ACT = action.shape[1]
    tb_blk = _pick_batch_block(B, tile_b)
    grid = (pl.cdiv(B, tb_blk),)

    w_kwargs = {"pipeline_mode": pl.Buffered(1)} if single_buffer_weights else {}

    def a_spec(d):
        return pl.BlockSpec((tb_blk, d), lambda i: (i, 0))

    def w_spec(arr):
        # Constant index_map -> weight block stays VMEM-resident across the batch grid.
        return pl.BlockSpec(arr.shape, lambda i: (0, 0), **w_kwargs)

    kernel = make_latent_critic_kernel(feat, tanh_in_bf16)

    # NOTE: if B % tb_blk != 0 the padded rows of the last block flow through rsqrt/tanh and are
    # discarded; avoid partial blocks when NaN-trapping debug infra is enabled.
    q = pl.pallas_call(
        kernel,
        out_shape=jax.ShapeDtypeStruct((B, 2), jnp.float32),
        grid=grid,
        in_specs=[a_spec(OB), a_spec(ACT),
                  w_spec(tw), w_spec(w1h), w_spec(w1a),
                  w_spec(q1w2), w_spec(q2w2), w_spec(w3), w_spec(bias)],
        out_specs=pl.BlockSpec((tb_blk, 2), lambda i: (i, 0)),
        compiler_params=pltpu.CompilerParams(
            dimension_semantics=("parallel",),          # megacore-shard the batch axis (v7x)
            vmem_limit_bytes=32 * 1024 * 1024,          # >= v5e default 16 MiB, <= v7x physical
        ),
    )(obs, action, tw, w1h, w1a, q1w2, q2w2, w3, bias)

    return q[:, 0:1], q[:, 1:2]


def init_params(key, ob_rep_dim, act_rep_dim, feature_dim, hidden_dim):
    """Deterministic synthetic init (stands in for utils.weight_init), 128-lane-padded fused layout."""
    feat_pad = _round_up(feature_dim, 128)
    hid_pad = _round_up(hidden_dim, 128)

    ks = jax.random.split(key, 14)

    def w(k, fi, fo):
        return jax.random.normal(k, (fi, fo), jnp.float32) / jnp.sqrt(fi)

    def b(k, fo):
        return 0.1 * jax.random.normal(k, (fo,), jnp.float32)

    def pad_cols(a, cols):
        return jnp.pad(a, ((0, 0), (0, cols - a.shape[1])))

    def pad_rows(a, rows):
        return jnp.pad(a, ((0, rows - a.shape[0]), (0, 0)))

    # trunk Linear(ob_rep_dim -> feature_dim), LayerNorm default init (padded lanes = 0).
    tw = pad_cols(w(ks[0], ob_rep_dim, feature_dim), feat_pad)              # (OB, FEAT_PAD)
    t_b = b(ks[1], feature_dim)
    lnw = jnp.ones((feature_dim,), jnp.float32)
    lnb = jnp.zeros((feature_dim,), jnp.float32)

    # per-head raw weights
    q1w1, q1b1 = w(ks[2], feature_dim + act_rep_dim, hidden_dim), b(ks[3], hidden_dim)
    q1w2, q1b2 = w(ks[4], hidden_dim, hidden_dim), b(ks[5], hidden_dim)
    q1w3, q1b3 = w(ks[6], hidden_dim, 1), b(ks[7], 1)
    q2w1, q2b1 = w(ks[8], feature_dim + act_rep_dim, hidden_dim), b(ks[9], hidden_dim)
    q2w2, q2b2 = w(ks[10], hidden_dim, hidden_dim), b(ks[11], hidden_dim)
    q2w3, q2b3 = w(ks[12], hidden_dim, 1), b(ks[13], 1)

    # fuse layer-1 of both heads column-wise; split into h-part / action-part; 128-lane pad.
    def split_pad(w1):
        wh = pad_rows(pad_cols(w1[:feature_dim, :], hid_pad), feat_pad)     # (FEAT_PAD, HID_PAD)
        wa = pad_cols(w1[feature_dim:, :], hid_pad)                         # (ACT, HID_PAD)
        return wh, wa

    q1wh, q1wa = split_pad(q1w1)
    q2wh, q2wa = split_pad(q2w1)
    w1h = jnp.concatenate([q1wh, q2wh], axis=1)                             # (FEAT_PAD, 2*HID_PAD)
    w1a = jnp.concatenate([q1wa, q2wa], axis=1)                             # (ACT, 2*HID_PAD)

    q1w2p = pad_rows(pad_cols(q1w2, hid_pad), hid_pad)                      # (HID_PAD, HID_PAD)
    q2w2p = pad_rows(pad_cols(q2w2, hid_pad), hid_pad)

    # final layer fused row-wise (row 0 = q1, row 1 = q2); kept f32 for the VPU reduce.
    w3 = jnp.stack([
        jnp.pad(q1w3[:, 0], (0, hid_pad - hidden_dim)),
        jnp.pad(q2w3[:, 0], (0, hid_pad - hidden_dim)),
    ], axis=0)                                                              # (2, HID_PAD)

    # pack all tiny bias / LN params into one (8, W) f32 bundle (single DMA, single VMEM tile).
    bw = max(feat_pad, 2 * hid_pad)
    bundle = jnp.zeros((8, bw), jnp.float32)
    bundle = bundle.at[0, :feature_dim].set(t_b)
    bundle = bundle.at[1, :feature_dim].set(lnw)
    bundle = bundle.at[2, :feature_dim].set(lnb)
    bundle = bundle.at[3, :hidden_dim].set(q1b1)
    bundle = bundle.at[3, hid_pad:hid_pad + hidden_dim].set(q2b1)
    bundle = bundle.at[4, :hidden_dim].set(q1b2)
    bundle = bundle.at[5, :hidden_dim].set(q2b2)
    bundle = bundle.at[6, 0].set(q1b3[0])
    bundle = bundle.at[6, 1].set(q2b3[0])

    return {
        "tw": tw.astype(jnp.bfloat16),
        "w1h": w1h.astype(jnp.bfloat16),
        "w1a": w1a.astype(jnp.bfloat16),
        "q1w2": q1w2p.astype(jnp.bfloat16),
        "q2w2": q2w2p.astype(jnp.bfloat16),
        "w3": w3,
        "bias": bundle,
        "feature_dim": feature_dim,
        "hidden_dim": hidden_dim,
        "hid_pad": hid_pad,
    }


def reference_forward(obs, action, params):
    """Pure-JAX f32 reference matching the PyTorch module, using the stored (bf16) weight values."""
    f32 = lambda a: a.astype(jnp.float32)
    feat = params["feature_dim"]
    hid_pad = params["hid_pad"]
    bias = params["bias"]

    h = obs @ f32(params["tw"])[:, :feat] + bias[0:1, :feat]
    mu = jnp.mean(h, axis=-1, keepdims=True)
    var = jnp.mean((h - mu) ** 2, axis=-1, keepdims=True)       # biased variance (PyTorch LN)
    h = (h - mu) / jnp.sqrt(var + LN_EPS) * bias[1:2, :feat] + bias[2:3, :feat]
    h = jnp.tanh(h)

    # concat([h, action]) @ W1  ==  h @ W1h + action @ W1a  (padded lanes contribute zeros)
    x = jnp.maximum(h @ f32(params["w1h"])[:feat, :] + action @ f32(params["w1a"])
                    + bias[3:4, :2 * hid_pad], 0.0)
    x1, x2 = x[:, :hid_pad], x[:, hid_pad:]
    y1 = jnp.maximum(x1 @ f32(params["q1w2"]) + bias[4:5, :hid_pad], 0.0)
    y2 = jnp.maximum(x2 @ f32(params["q2w2"]) + bias[5:6, :hid_pad], 0.0)
    q1 = jnp.sum(y1 * params["w3"][0:1, :], axis=-1, keepdims=True) + bias[6:7, 0:1]
    q2 = jnp.sum(y2 * params["w3"][1:2, :], axis=-1, keepdims=True) + bias[6:7, 1:2]
    return q1, q2


if __name__ == "__main__":
    B, OB, ACT, FEAT, HID = 8, 32, 16, 32, 32

    key = jax.random.PRNGKey(0)
    k_obs, k_act, k_par = jax.random.split(key, 3)
    obs = jax.random.normal(k_obs, (B, OB), jnp.float32)
    action = jax.random.normal(k_act, (B, ACT), jnp.float32)
    params = init_params(k_par, OB, ACT, FEAT, HID)

    q1, q2 = latent_critic_forward(obs, action, params)
    q1 = jax.block_until_ready(q1)
    q2 = jax.block_until_ready(q2)

    r1, r2 = reference_forward(obs, action, params)
    assert q1.shape == (B, 1) and q2.shape == (B, 1)
    # bf16 matmul operands / bf16 tanh -> loosened tolerance (f32 accumulation, LN, reduce).
    assert jnp.allclose(q1, r1, atol=5e-2, rtol=5e-2)
    assert jnp.allclose(q2, r2, atol=5e-2, rtol=5e-2)

    print("KERNEL_OK")
</pallas_src>

<mosaic_0001>
module attributes {stable_mosaic.version = 11 : i64} {
  func.func @kernel(%arg0: i32, %arg1: memref<8x32xf32, #tpu.memory_space<vmem>>, %arg2: memref<8x16xf32, #tpu.memory_space<vmem>>, %arg3: memref<32x128xbf16, #tpu.memory_space<vmem>>, %arg4: memref<128x256xbf16, #tpu.memory_space<vmem>>, %arg5: memref<16x256xbf16, #tpu.memory_space<vmem>>, %arg6: memref<128x128xbf16, #tpu.memory_space<vmem>>, %arg7: memref<128x128xbf16, #tpu.memory_space<vmem>>, %arg8: memref<2x128xf32, #tpu.memory_space<vmem>>, %arg9: memref<8x256xf32, #tpu.memory_space<vmem>>, %arg10: memref<8x2xf32, #tpu.memory_space<vmem>>) attributes {dimension_semantics = [#tpu.dimension_semantics<parallel>], iteration_bounds = array<i64: 1>, scalar_prefetch = 0 : i64, scratch_operands = 0 : i64, tpu.core_type = #tpu.core_type<tc>, window_params = [{transform_indices = @transform_0, window_bounds = array<i64: 8, 32>}, {transform_indices = @transform_1, window_bounds = array<i64: 8, 16>}, {pipeline_mode = #tpu.pipeline_mode<synchronous>, transform_indices = @transform_2, window_bounds = array<i64: 32, 128>}, {pipeline_mode = #tpu.pipeline_mode<synchronous>, transform_indices = @transform_3, window_bounds = array<i64: 128, 256>}, {pipeline_mode = #tpu.pipeline_mode<synchronous>, transform_indices = @transform_4, window_bounds = array<i64: 16, 256>}, {pipeline_mode = #tpu.pipeline_mode<synchronous>, transform_indices = @transform_5, window_bounds = array<i64: 128, 128>}, {pipeline_mode = #tpu.pipeline_mode<synchronous>, transform_indices = @transform_6, window_bounds = array<i64: 128, 128>}, {pipeline_mode = #tpu.pipeline_mode<synchronous>, transform_indices = @transform_7, window_bounds = array<i64: 2, 128>}, {pipeline_mode = #tpu.pipeline_mode<synchronous>, transform_indices = @transform_8, window_bounds = array<i64: 8, 256>}, {transform_indices = @transform_9, window_bounds = array<i64: 8, 2>}]} {
    %c0 = arith.constant 0 : index
    %c0_0 = arith.constant 0 : index
    %0 = vector.load %arg9[%c0, %c0_0] : memref<8x256xf32, #tpu.memory_space<vmem>>, vector<8x256xf32>
    %1 = vector.extract_strided_slice %0 {offsets = [0, 0], sizes = [1, 128], strides = [1, 1]} : vector<8x256xf32> to vector<1x128xf32>
    %2 = vector.extract_strided_slice %0 {offsets = [1, 0], sizes = [1, 128], strides = [1, 1]} : vector<8x256xf32> to vector<1x128xf32>
    %3 = vector.extract_strided_slice %0 {offsets = [2, 0], sizes = [1, 128], strides = [1, 1]} : vector<8x256xf32> to vector<1x128xf32>
    %4 = vector.extract_strided_slice %0 {offsets = [3, 0], sizes = [1, 256], strides = [1, 1]} : vector<8x256xf32> to vector<1x256xf32>
    %5 = vector.extract_strided_slice %0 {offsets = [4, 0], sizes = [1, 128], strides = [1, 1]} : vector<8x256xf32> to vector<1x128xf32>
    %6 = vector.extract_strided_slice %0 {offsets = [5, 0], sizes = [1, 128], strides = [1, 1]} : vector<8x256xf32> to vector<1x128xf32>
    %7 = vector.extract_strided_slice %0 {offsets = [6, 0], sizes = [1, 2], strides = [1, 1]} : vector<8x256xf32> to vector<1x2xf32>
    %c0_1 = arith.constant 0 : index
    %c0_2 = arith.constant 0 : index
    %8 = vector.load %arg1[%c0_1, %c0_2] : memref<8x32xf32, #tpu.memory_space<vmem>>, vector<8x32xf32>
    %9 = arith.truncf %8 : vector<8x32xf32> to vector<8x32xbf16>
    %c0_3 = arith.constant 0 : index
    %c0_4 = arith.constant 0 : index
    %10 = vector.load %arg2[%c0_3, %c0_4] : memref<8x16xf32, #tpu.memory_space<vmem>>, vector<8x16xf32>
    %11 = arith.truncf %10 : vector<8x16xf32> to vector<8x16xbf16>
    %c0_5 = arith.constant 0 : index
    %c0_6 = arith.constant 0 : index
    %12 = vector.load %arg3[%c0_5, %c0_6] : memref<32x128xbf16, #tpu.memory_space<vmem>>, vector<32x128xbf16>
    %cst = arith.constant dense<0.000000e+00> : vector<8x128xf32>
    %13 = tpu.matmul %9, %12, %cst {dimension_numbers = #tpu.dot_dimension_numbers<[1], [0], [0], [1], [0, 0, 1, 1], [], []>} : vector<8x32xbf16>, vector<32x128xbf16>, vector<8x128xf32> -> vector<8x128xf32>
    %14 = vector.broadcast %1 : vector<1x128xf32> to vector<8x128xf32>
    %15 = arith.addf %13, %14 : vector<8x128xf32>
    %cst_7 = arith.constant dense<0.000000e+00> : vector<8xf32>
    %16 = vector.multi_reduction <add>, %15, %cst_7 [1] : vector<8x128xf32> to vector<8xf32>
    %17 = vector.shape_cast %16 : vector<8xf32> to vector<8x1xf32>
    %cst_8 = arith.constant 3.125000e-02 : f32
    %18 = vector.broadcast %cst_8 : f32 to vector<8x1xf32>
    %19 = arith.mulf %17, %18 : vector<8x1xf32>
    %20 = vector.broadcast %19 : vector<8x1xf32> to vector<8x128xf32>
    %21 = arith.subf %15, %20 : vector<8x128xf32>
    %22 = tpu.iota {dimensions = array<i32: 1>} : vector<8x128xi32>
    %c32_i32 = arith.constant 32 : i32
    %23 = vector.broadcast %c32_i32 : i32 to vector<8x128xi32>
    %24 = arith.cmpi slt, %22, %23 : vector<8x128xi32>
    %cst_9 = arith.constant 0.000000e+00 : f32
    %25 = vector.broadcast %cst_9 : f32 to vector<8x128xf32>
    %26 = arith.select %24, %21, %25 : vector<8x128xi1>, vector<8x128xf32>
    %27 = arith.mulf %26, %26 : vector<8x128xf32>
    %cst_10 = arith.constant dense<0.000000e+00> : vector<8xf32>
    %28 = vector.multi_reduction <add>, %27, %cst_10 [1] : vector<8x128xf32> to vector<8xf32>
    %29 = vector.shape_cast %28 : vector<8xf32> to vector<8x1xf32>
    %cst_11 = arith.constant 3.125000e-02 : f32
    %30 = vector.broadcast %cst_11 : f32 to vector<8x1xf32>
    %31 = arith.mulf %29, %30 : vector<8x1xf32>
    %cst_12 = arith.constant 9.99999974E-6 : f32
    %32 = vector.broadcast %cst_12 : f32 to vector<8x1xf32>
    %33 = arith.addf %31, %32 : vector<8x1xf32>
    %34 = math.rsqrt %33 : vector<8x1xf32>
    %35 = vector.broadcast %34 : vector<8x1xf32> to vector<8x128xf32>
    %36 = arith.mulf %26, %35 : vector<8x128xf32>
    %37 = vector.broadcast %2 : vector<1x128xf32> to vector<8x128xf32>
    %38 = arith.mulf %36, %37 : vector<8x128xf32>
    %39 = vector.broadcast %3 : vector<1x128xf32> to vector<8x128xf32>
    %40 = arith.addf %38, %39 : vector<8x128xf32>
    %41 = arith.truncf %40 : vector<8x128xf32> to vector<8x128xbf16>
    %42 = math.tanh %41 : vector<8x128xbf16>
    %c0_13 = arith.constant 0 : index
    %c0_14 = arith.constant 0 : index
    %43 = vector.load %arg4[%c0_13, %c0_14] : memref<128x256xbf16, #tpu.memory_space<vmem>>, vector<128x256xbf16>
    %cst_15 = arith.constant dense<0.000000e+00> : vector<8x256xf32>
    %44 = tpu.matmul %42, %43, %cst_15 {dimension_numbers = #tpu.dot_dimension_numbers<[1], [0], [0], [1], [0, 0, 1, 1], [], []>} : vector<8x128xbf16>, vector<128x256xbf16>, vector<8x256xf32> -> vector<8x256xf32>
    %c0_16 = arith.constant 0 : index
    %c0_17 = arith.constant 0 : index
    %45 = vector.load %arg5[%c0_16, %c0_17] : memref<16x256xbf16, #tpu.memory_space<vmem>>, vector<16x256xbf16>
    %cst_18 = arith.constant dense<0.000000e+00> : vector<8x256xf32>
    %46 = tpu.matmul %11, %45, %cst_18 {dimension_numbers = #tpu.dot_dimension_numbers<[1], [0], [0], [1], [0, 0, 1, 1], [], []>} : vector<8x16xbf16>, vector<16x256xbf16>, vector<8x256xf32> -> vector<8x256xf32>
    %47 = arith.addf %44, %46 : vector<8x256xf32>
    %48 = vector.broadcast %4 : vector<1x256xf32> to vector<8x256xf32>
    %49 = arith.addf %47, %48 : vector<8x256xf32>
    %cst_19 = arith.constant 0.000000e+00 : f32
    %50 = vector.broadcast %cst_19 : f32 to vector<8x256xf32>
    %51 = arith.maximumf %49, %50 : vector<8x256xf32>
    %52 = vector.extract_strided_slice %51 {offsets = [0, 0], sizes = [8, 128], strides = [1, 1]} : vector<8x256xf32> to vector<8x128xf32>
    %53 = arith.truncf %52 : vector<8x128xf32> to vector<8x128xbf16>
    %54 = vector.extract_strided_slice %51 {offsets = [0, 128], sizes = [8, 128], strides = [1, 1]} : vector<8x256xf32> to vector<8x128xf32>
    %55 = arith.truncf %54 : vector<8x128xf32> to vector<8x128xbf16>
    %c0_20 = arith.constant 0 : index
    %c0_21 = arith.constant 0 : index
    %56 = vector.load %arg6[%c0_20, %c0_21] : memref<128x128xbf16, #tpu.memory_space<vmem>>, vector<128x128xbf16>
    %cst_22 = arith.constant dense<0.000000e+00> : vector<8x128xf32>
    %57 = tpu.matmul %53, %56, %cst_22 {dimension_numbers = #tpu.dot_dimension_numbers<[1], [0], [0], [1], [0, 0, 1, 1], [], []>} : vector<8x128xbf16>, vector<128x128xbf16>, vector<8x128xf32> -> vector<8x128xf32>
    %58 = vector.broadcast %5 : vector<1x128xf32> to vector<8x128xf32>
    %59 = arith.addf %57, %58 : vector<8x128xf32>
    %cst_23 = arith.constant 0.000000e+00 : f32
    %60 = vector.broadcast %cst_23 : f32 to vector<8x128xf32>
    %61 = arith.maximumf %59, %60 : vector<8x128xf32>
    %c0_24 = arith.constant 0 : index
    %c0_25 = arith.constant 0 : index
    %62 = vector.load %arg7[%c0_24, %c0_25] : memref<128x128xbf16, #tpu.memory_space<vmem>>, vector<128x128xbf16>
    %cst_26 = arith.constant dense<0.000000e+00> : vector<8x128xf32>
    %63 = tpu.matmul %55, %62, %cst_26 {dimension_numbers = #tpu.dot_dimension_numbers<[1], [0], [0], [1], [0, 0, 1, 1], [], []>} : vector<8x128xbf16>, vector<128x128xbf16>, vector<8x128xf32> -> vector<8x128xf32>
    %64 = vector.broadcast %6 : vector<1x128xf32> to vector<8x128xf32>
    %65 = arith.addf %63, %64 : vector<8x128xf32>
    %cst_27 = arith.constant 0.000000e+00 : f32
    %66 = vector.broadcast %cst_27 : f32 to vector<8x128xf32>
    %67 = arith.maximumf %65, %66 : vector<8x128xf32>
    %c0_28 = arith.constant 0 : index
    %c0_29 = arith.constant 0 : index
    %68 = vector.load %arg8[%c0_28, %c0_29] : memref<2x128xf32, #tpu.memory_space<vmem>>, vector<2x128xf32>
    %69 = vector.extract_strided_slice %68 {offsets = [0, 0], sizes = [1, 128], strides = [1, 1]} : vector<2x128xf32> to vector<1x128xf32>
    %70 = vector.broadcast %69 : vector<1x128xf32> to vector<8x128xf32>
    %71 = arith.mulf %61, %70 : vector<8x128xf32>
    %cst_30 = arith.constant dense<0.000000e+00> : vector<8xf32>
    %72 = vector.multi_reduction <add>, %71, %cst_30 [1] : vector<8x128xf32> to vector<8xf32>
    %73 = vector.shape_cast %72 : vector<8xf32> to vector<8x1xf32>
    %74 = vector.extract_strided_slice %68 {offsets = [1, 0], sizes = [1, 128], strides = [1, 1]} : vector<2x128xf32> to vector<1x128xf32>
    %75 = vector.broadcast %74 : vector<1x128xf32> to vector<8x128xf32>
    %76 = arith.mulf %67, %75 : vector<8x128xf32>
    %cst_31 = arith.constant dense<0.000000e+00> : vector<8xf32>
    %77 = vector.multi_reduction <add>, %76, %cst_31 [1] : vector<8x128xf32> to vector<8xf32>
    %78 = vector.shape_cast %77 : vector<8xf32> to vector<8x1xf32>
    %79 = tpu.concatenate %73, %78 in 1 : vector<8x1xf32>, vector<8x1xf32> -> vector<8x2xf32>
    %80 = vector.broadcast %7 : vector<1x2xf32> to vector<8x2xf32>
    %81 = arith.addf %79, %80 : vector<8x2xf32>
    %c0_32 = arith.constant 0 : index
    %c0_33 = arith.constant 0 : index
    %82 = vector.load %arg10[%c0_32, %c0_33] : memref<8x2xf32, #tpu.memory_space<vmem>>, vector<8x2xf32>
    tpu.vector_store %arg10[%c0_32, %c0_33], %81 {strides = array<i32>} : memref<8x2xf32, #tpu.memory_space<vmem>>, vector<8x2xf32>,
    return
  }
  func.func @transform_0(%arg0: i32) -> (i32, i32) {
    %c0_i32 = arith.constant 0 : i32
    %c0_i32_0 = arith.constant 0 : i32
    return %arg0, %c0_i32 : i32, i32
  }
  func.func @transform_1(%arg0: i32) -> (i32, i32) {
    %c0_i32 = arith.constant 0 : i32
    %c0_i32_0 = arith.constant 0 : i32
    return %arg0, %c0_i32 : i32, i32
  }
  func.func @transform_2(%arg0: i32) -> (i32, i32) {
    %c0_i32 = arith.constant 0 : i32
    %c0_i32_0 = arith.constant 0 : i32
    %c0_i32_1 = arith.constant 0 : i32
    return %c0_i32, %c0_i32_0 : i32, i32
  }
  func.func @transform_3(%arg0: i32) -> (i32, i32) {
    %c0_i32 = arith.constant 0 : i32
    %c0_i32_0 = arith.constant 0 : i32
    %c0_i32_1 = arith.constant 0 : i32
    return %c0_i32, %c0_i32_0 : i32, i32
  }
  func.func @transform_4(%arg0: i32) -> (i32, i32) {
    %c0_i32 = arith.constant 0 : i32
    %c0_i32_0 = arith.constant 0 : i32
    %c0_i32_1 = arith.constant 0 : i32
    return %c0_i32, %c0_i32_0 : i32, i32
  }
  func.func @transform_5(%arg0: i32) -> (i32, i32) {
    %c0_i32 = arith.constant 0 : i32
    %c0_i32_0 = arith.constant 0 : i32
    %c0_i32_1 = arith.constant 0 : i32
    return %c0_i32, %c0_i32_0 : i32, i32
  }
  func.func @transform_6(%arg0: i32) -> (i32, i32) {
    %c0_i32 = arith.constant 0 : i32
    %c0_i32_0 = arith.constant 0 : i32
    %c0_i32_1 = arith.constant 0 : i32
    return %c0_i32, %c0_i32_0 : i32, i32
  }
  func.func @transform_7(%arg0: i32) -> (i32, i32) {
    %c0_i32 = arith.constant 0 : i32
    %c0_i32_0 = arith.constant 0 : i32
    %c0_i32_1 = arith.constant 0 : i32
    return %c0_i32, %c0_i32_0 : i32, i32
  }
  func.func @transform_8(%arg0: i32) -> (i32, i32) {
    %c0_i32 = arith.constant 0 : i32
    %c0_i32_0 = arith.constant 0 : i32
    %c0_i32_1 = arith.constant 0 : i32
    return %c0_i32, %c0_i32_0 : i32, i32
  }
  func.func @transform_9(%arg0: i32) -> (i32, i32) {
    %c0_i32 = arith.constant 0 : i32
    %c0_i32_0 = arith.constant 0 : i32
    return %arg0, %c0_i32 : i32, i32
  }
}

</mosaic_0001>

<bundles_post_ra>
// kernel: tpu_custom_call.1
= control target key start
LH: loop header
LB: loop body
LE: loop exit
PB: predicated region body
PF: predicated region fallthrough
CT: control target
= control target key end

     0   :  { %14 = vsyncpa [#allocation3], 0  ;;  %s1255_s0 = inlined_call_operand.hbm [shape: f32[8,32], index: 0, kind: input, shape index: {}]   ;;  %s1256_s1 = inlined_call_operand.hbm [shape: f32[8,16], index: 1, kind: input, shape index: {}]   ;;  %s1257_s2 = inlined_call_operand.hbm [shape: bf16[32,128], index: 2, kind: input, shape index: {}]   ;;  %s1258_s3 = inlined_call_operand.hbm [shape: bf16[128,256], index: 3, kind: input, shape index: {}]   ;;  %s1259_s4 = inlined_call_operand.hbm [shape: bf16[16,256], index: 4, kind: input, shape index: {}]   ;;  %s1260_s5 = inlined_call_operand.hbm [shape: bf16[128,128], index: 5, kind: input, shape index: {}]   ;;  %s1261_s6 = inlined_call_operand.hbm [shape: bf16[128,128], index: 6, kind: input, shape index: {}]   ;;  %s1262_s7 = inlined_call_operand.vmem [shape: f32[2,128], index: 7, kind: input, shape index: {}]   ;;  %s1263_s8 = inlined_call_operand.vmem [shape: f32[8,256], index: 8, kind: input, shape index: {}]   ;;  %s1264_s9 = inlined_call_operand.vmem [shape: f32[8,2], index: 9, kind: output, shape index: {}]  }
   0x1   :  { %15 = vsyncpa [#allocation5], 0 }
   0x2   :  { %16 = vsyncpa [#allocation8], 0 }
   0x3   :  { %17 = vsyncpa [#allocation11], 0  ;;  %s1011_s30 = smov [#allocation4]   ;;  %s1012_s11 = smov [#allocation7]  }
   0x4   :  { %s34_s10 = sshll.u32 %s1011_s30, 4  ;;  %s55_s12 = sshll.u32 %s1012_s11, 4  ;;  %s35_s10 = int_to_ptr.vmem [resolvable:$true] %s34_s10  ;;  %s1075_s12 = int_to_ptr.vmem [resolvable:$true] %s55_s12 }
   0x5   :  { %s849_s15 = scalar_lea.hbm %s1256_s1, 128 }
   0x6   :  { %p850_p0 = scmp.ne.s32.totalorder %s1256_s1, %s849_s15  ;;  %p853_p1 = scmp.lt.u32.totalorder %s849_s15, %s1256_s1 }
   0x8   :  { %p855_p2 = pnand %p853_p1, %p850_p0 }
   0xa   :  { %858 = shalt.err (!%p855_p2)
}
   0xb   :  { %s859_s20 = scalar_lea.vmem %s35_s10, 128  ;;  %p864_p4 = scmp.lt.s32.totalorder %s35_s10, %s35_s10 }
   0xc   :  { %p860_p3 = scmp.ne.s32.totalorder %s35_s10, %s859_s20  ;;  %p865_p5 = scmp.lt.s32.totalorder %s859_s20, %s859_s20 }
   0xe   :  { %p866_p6 = por %p865_p5, %p864_p4 }
  0x10   :  { %p867_p7 = pnand %p866_p6, %p860_p3 }
  0x12   :  { %870 = shalt.err (!%p867_p7)
}
  0x13   :  { %37 = dma.hbm_to_vmem [thread:$0]  %s1256_s1, 128, %s35_s10, [#allocation5]  }
  0x14   :  { %s871_s25 = scalar_lea.hbm %s1258_s3, 2048 }
  0x15   :  { %p872_p8 = scmp.ne.s32.totalorder %s1258_s3, %s871_s25  ;;  %p875_p9 = scmp.lt.u32.totalorder %s871_s25, %s1258_s3 }
  0x17   :  { %p877_p10 = pnand %p875_p9, %p872_p8 }
  0x19   :  { %880 = shalt.err (!%p877_p10)
}
  0x1a   :  { %s881_s30 = scalar_lea.vmem %s1075_s12, 2048  ;;  %p886_p12 = scmp.lt.s32.totalorder %s1075_s12, %s1075_s12 }
  0x1b   :  { %p882_p11 = scmp.ne.s32.totalorder %s1075_s12, %s881_s30  ;;  %p887_p13 = scmp.lt.s32.totalorder %s881_s30, %s881_s30 }
  0x1d   :  { %p888_p0 = por %p887_p13, %p886_p12 }
  0x1f   :  { %p889_p1 = pnand %p888_p0, %p882_p11 }
  0x21   :  { %892 = shalt.err (!%p889_p1)
}
  0x22   :  { %s1013_s1 = smov 128   ;;  %s1014_s10 = smov 8  }
  0x23   :  { %61 = dma.hbm_to_vmem [thread:$0]  %s1258_s3, 2048, %s1075_s12, [#allocation8], %s1013_s1, %s1013_s1, %s1014_s10  }
  0x24   :  { %s1015_s14 = smov [#allocation10]   ;;  %s1016_s16 = smov [#allocation2]  }
  0x25   :  { %s79_s15 = sshll.u32 %s1015_s14, 4  ;;  %s24_s17 = sshll.u32 %s1016_s16, 4  ;;  %s80_s15 = int_to_ptr.vmem [resolvable:$true] %s79_s15  ;;  %s25_s17 = int_to_ptr.vmem [resolvable:$true] %s24_s17 }
  0x26   :  { %s893_s20 = scalar_lea.hbm %s1260_s5, 1024 }
  0x27   :  { %p894_p2 = scmp.ne.s32.totalorder %s1260_s5, %s893_s20  ;;  %p897_p3 = scmp.lt.u32.totalorder %s893_s20, %s1260_s5 }
  0x29   :  { %p899_p4 = pnand %p897_p3, %p894_p2 }
  0x2b   :  { %902 = shalt.err (!%p899_p4)
}
  0x2c   :  { %s903_s3 = scalar_lea.vmem %s80_s15, 1024  ;;  %p908_p6 = scmp.lt.s32.totalorder %s80_s15, %s80_s15 }
  0x2d   :  { %p904_p5 = scmp.ne.s32.totalorder %s80_s15, %s903_s3  ;;  %p909_p7 = scmp.lt.s32.totalorder %s903_s3, %s903_s3 }
  0x2f   :  { %p910_p8 = por %p909_p7, %p908_p6 }
  0x31   :  { %p911_p9 = pnand %p910_p8, %p904_p5 }
  0x33   :  { %914 = shalt.err (!%p911_p9)
}
  0x34   :  { %s1017_s12 = smov 64   ;;  %s1018_s25 = smov 4  }
  0x35   :  { %85 = dma.hbm_to_vmem [thread:$0]  %s1260_s5, 1024, %s80_s15, [#allocation11], %s1017_s12, %s1017_s12, %s1018_s25  }
  0x36   :  { %s915_s30 = scalar_lea.hbm %s1255_s0, 128 }
  0x37   :  { %p916_p10 = scmp.ne.s32.totalorder %s1255_s0, %s915_s30  ;;  %p919_p11 = scmp.lt.u32.totalorder %s915_s30, %s1255_s0 }
  0x39   :  { %p921_p12 = pnand %p919_p11, %p916_p10 }
  0x3b   :  { %924 = shalt.err (!%p921_p12)
}
  0x3c   :  { %s925_s18 = scalar_lea.vmem %s25_s17, 128  ;;  %p930_p0 = scmp.lt.s32.totalorder %s25_s17, %s25_s17 }
  0x3d   :  { %p926_p13 = scmp.ne.s32.totalorder %s25_s17, %s925_s18  ;;  %p931_p1 = scmp.lt.s32.totalorder %s925_s18, %s925_s18 }
  0x3f   :  { %p932_p2 = por %p931_p1, %p930_p0 }
  0x41   :  { %p933_p3 = pnand %p932_p2, %p926_p13 }
  0x43   :  { %936 = shalt.err (!%p933_p3)
}
  0x44   :  { %27 = dma.hbm_to_vmem [thread:$0]  %s1255_s0, 128, %s25_s17, [#allocation3]  }
  0x45   :  { %s1019_s19 = smov [#allocation6]   ;;  %s1020_s21 = smov [#allocation9]  }
  0x46   :  { %s43_s20 = sshll.u32 %s1019_s19, 4  ;;  %s67_s22 = sshll.u32 %s1020_s21, 4  ;;  %s44_s20 = int_to_ptr.vmem [resolvable:$true] %s43_s20  ;;  %s1136_s22 = int_to_ptr.vmem [resolvable:$true] %s67_s22 }
  0x47   :  { %s937_s3 = scalar_lea.hbm %s1257_s2, 256 }
  0x48   :  { %p938_p4 = scmp.ne.s32.totalorder %s1257_s2, %s937_s3  ;;  %p941_p5 = scmp.lt.u32.totalorder %s937_s3, %s1257_s2 }
  0x4a   :  { %p943_p6 = pnand %p941_p5, %p938_p4 }
  0x4c   :  { %946 = shalt.err (!%p943_p6)
}
  0x4d   :  { %s947_s0 = scalar_lea.vmem %s44_s20, 256  ;;  %p952_p8 = scmp.lt.s32.totalorder %s44_s20, %s44_s20 }
  0x4e   :  { %p948_p7 = scmp.ne.s32.totalorder %s44_s20, %s947_s0  ;;  %p953_p9 = scmp.lt.s32.totalorder %s947_s0, %s947_s0 }
  0x50   :  { %p954_p10 = por %p953_p9, %p952_p8 }
  0x52   :  { %p955_p11 = pnand %p954_p10, %p948_p7 }
  0x54   :  { %958 = shalt.err (!%p955_p11)
}
  0x55   :  { %49 = dma.hbm_to_vmem [thread:$0]  %s1257_s2, 256, %s44_s20, [#allocation5], %s1017_s12, %s1017_s12, %s1018_s25  }
  0x56   :  { %s959_s14 = scalar_lea.hbm %s1259_s4, 256 }
  0x57   :  { %p960_p12 = scmp.ne.s32.totalorder %s1259_s4, %s959_s14  ;;  %p963_p13 = scmp.lt.u32.totalorder %s959_s14, %s1259_s4 }
  0x59   :  { %p965_p0 = pnand %p963_p13, %p960_p12 }
  0x5b   :  { %968 = shalt.err (!%p965_p0)
}
  0x5c   :  { %s969_s19 = scalar_lea.vmem %s1136_s22, 256  ;;  %p974_p2 = scmp.lt.s32.totalorder %s1136_s22, %s1136_s22 }
  0x5d   :  { %p970_p1 = scmp.ne.s32.totalorder %s1136_s22, %s969_s19  ;;  %p975_p3 = scmp.lt.s32.totalorder %s969_s19, %s969_s19 }
  0x5f   :  { %p976_p4 = por %p975_p3, %p974_p2 }
  0x61   :  { %p977_p5 = pnand %p976_p4, %p970_p1 }
  0x63   :  { %980 = shalt.err (!%p977_p5)
}
  0x64   :  { %73 = dma.hbm_to_vmem [thread:$0]  %s1259_s4, 256, %s1136_s22, [#allocation8], %s1013_s1, %s1013_s1, %s1014_s10  }
  0x65   :  { %s1021_s21 = smov [#allocation12]   ;;  %s981_s26 = scalar_lea.hbm %s1261_s6, 1024 }
  0x66   :  { %s91_s23 = sshll.u32 %s1021_s21, 4  ;;  %p982_p6 = scmp.ne.s32.totalorder %s1261_s6, %s981_s26  ;;  %s92_s23 = int_to_ptr.vmem [resolvable:$true] %s91_s23 }
  0x67   :  { %p985_p7 = scmp.lt.u32.totalorder %s981_s26, %s1261_s6 }
  0x69   :  { %p987_p8 = pnand %p985_p7, %p982_p6 }
  0x6b   :  { %990 = shalt.err (!%p987_p8)
}
  0x6c   :  { %s991_s17 = scalar_lea.vmem %s92_s23, 1024  ;;  %p996_p10 = scmp.lt.s32.totalorder %s92_s23, %s92_s23 }
  0x6d   :  { %p992_p9 = scmp.ne.s32.totalorder %s92_s23, %s991_s17  ;;  %p997_p11 = scmp.lt.s32.totalorder %s991_s17, %s991_s17 }
  0x6f   :  { %p998_p12 = por %p997_p11, %p996_p10 }
  0x71   :  { %p999_p13 = pnand %p998_p12, %p992_p9 }
  0x73   :  { %1002 = shalt.err (!%p999_p13)
}
  0x74   :  { %97 = dma.hbm_to_vmem [thread:$0]  %s1261_s6, 1024, %s92_s23, [#allocation11], %s1017_s12, %s1017_s12, %s1018_s25  }
  0x75   :  { %1003 = dma.done.wait [#allocation3], 128  }
  0x76   :  { %1004 = vsyncadd [#allocation3], 4294967168 }
  0x77   :  { %1005 = dma.done.wait [#allocation5], 384  }
  0x78   :  { %1006 = vsyncadd [#allocation5], 4294966912 }
  0x79   :  { %1007 = dma.done.wait [#allocation8], 2304  }
  0x7a   :  { %1008 = vsyncadd [#allocation8], 4294964992 }
  0x7b   :  { %1009 = dma.done.wait [#allocation11], 2048  }
  0x7c   :  { %1010 = vsyncadd [#allocation11], 4294965248  ;;  %v1022_v0 = vmov 0.0   ;;  %vm1023_vm0 = vmmov 0   ;;  %v800_v1 = vld [vmem:[#allocation6] sm:$0xff]   ;;  %v801_v2 = vld [vmem:[#allocation6 + $0x8] sm:$0xff]   ;;  %v134_v5 = vlaneseq }
  0x7d   :  { %738 = vmatprep.subr.bf16.mxu0 %v1022_v0  ;;  %742 = vmatprep.mubr.msk.bf16.mxu0 %vm1023_vm0, %v1022_v0  ;;  %v126_v3 = vld [vmem:[#allocation2] sm:$0xff]  ;;  %vm150_vm1 = vcmask 261120   ;;  %v1198_v8 = vld [vmem:[%s1263_s8] sm:$0xff]  ;;  %v805_v23 = vld [vmem:[#allocation7 + $0x14] ss:$8 sps:$4 sm:$0xff]   ;;  %v1024_v40 = vmov 0  }
  0x7e   :  { %739 = vmatpush3.bf16.msra.mxu0 %v800_v1  ;;  %v127_v4 = vpack.c.bf16 %v126_v3, %v126_v3  ;;  %v1192_v6 = vshrl.u32 %v134_v5, 7  ;;  %v199_v15 = vand.u32 127, %v134_v5  ;;  %v802_v21 = vld [vmem:[#allocation7 + $0x4] ss:$8 sps:$4 sm:$0xff]   ;;  %v804_v22 = vld [vmem:[#allocation7] ss:$8 sps:$4 sm:$0xff]   ;;  %406 = vmatprep.mubr.bf16.mxu1 %v1024_v40 }
  0x7f   :  { %740 = vmatprep.subr.bf16.mxu0 %v1022_v0  ;;  %374 = vmatprep.subr.bf16.mxu1 %v802_v21  ;;  %v807_v24 = vld [vmem:[#allocation7 + $0x10] ss:$8 sps:$4 sm:$0xff]   ;;  %v808_v25 = vld [vmem:[#allocation7 + $0x24] ss:$8 sps:$4 sm:$0xff]   ;;  %v810_v26 = vld [vmem:[#allocation7 + $0x20] ss:$8 sps:$4 sm:$0xff]  }
  0x80   :  { %v136_v7 = vsub.s32 0, %v1192_v6  ;;  %vm200_vm2 = vcmp.lt.s32.totalorder %v199_v15, 32  ;;  %375 = vmatpush1.bf16.msra.mxu1 %v804_v22  ;;  %v811_v27 = vld [vmem:[#allocation7 + $0x34] ss:$8 sps:$4 sm:$0xff]   ;;  %v813_v28 = vld [vmem:[#allocation7 + $0x30] ss:$8 sps:$4 sm:$0xff]  }
  0x81   :  { %376 = vmatprep.subr.bf16.mxu1 %v805_v23  ;;  %v814_v29 = vld [vmem:[#allocation7 + $0x44] ss:$8 sps:$4 sm:$0xff]   ;;  %v816_v30 = vld [vmem:[#allocation7 + $0x40] ss:$8 sps:$4 sm:$0xff]   ;;  %v817_v31 = vld [vmem:[#allocation7 + $0x54] ss:$8 sps:$4 sm:$0xff]  }
  0x82   :  { %741 = vmatpush3.bf16.msra.mxu0 %v801_v2  ;;  %v137_v9 = vrot.slane %v1198_v8, %v136_v7  ;;  %v819_v32 = vld [vmem:[#allocation7 + $0x50] ss:$8 sps:$4 sm:$0xff]   ;;  %v820_v33 = vld [vmem:[#allocation9] ss:$8 sps:$4 sm:$0xff]   ;;  %v822_v34 = vld [vmem:[#allocation9 + $0x4] ss:$8 sps:$4 sm:$0xff]  }
  0x83   :  { %v823_v35 = vld [vmem:[#allocation7 + $0x64] ss:$8 sps:$4 sm:$0xff]   ;;  %v825_v36 = vld [vmem:[#allocation7 + $0x60] ss:$8 sps:$4 sm:$0xff]   ;;  %253 = vmatprep.subr.bf16.mxu0 %v822_v34  ;;  %v826_v38 = vld [vmem:[#allocation7 + $0x74] ss:$8 sps:$4 sm:$0xff]  }
  0x84   :  { %377 = vmatpush1.bf16.msra.mxu1 %v807_v24  ;;  %v128_v37 = vld [vmem:[#allocation4] sm:$0xff]  ;;  %vm249_vm3 = vcmask 130048   ;;  %v828_v41 = vld [vmem:[#allocation7 + $0x70] ss:$8 sps:$4 sm:$0xff]   ;;  %v833_v44 = vld [vmem:[#allocation10 + $0x10] sm:$0xff]   ;;  %v211_v51 = vsub.s32 1, %v1192_v6 }
  0x85   :  { %743 = vmatmul.mubr.msk.bf16.vlgmr.msra.gmra.mrb[0].mxu0 %vm150_vm1, %v127_v4  ;;  %378 = vmatprep.subr.bf16.mxu1 %v808_v25  ;;  %v129_v39 = vpack.c.bf16 %v128_v37, %v128_v37  ;;  %v829_v42 = vld [vmem:[#allocation10] sm:$0xff]   ;;  %v831_v43 = vld [vmem:[#allocation10 + $0x8] sm:$0xff]   ;;  %v835_v45 = vld [vmem:[#allocation10 + $0x18] sm:$0xff]   ;;  %v216_v52 = vsub.s32 2, %v1192_v6  ;;  %v417_v15 = vsub.s32 3, %v1192_v6  ;;  %vm662_vm4 = vcmask 7168  }
  0x86   :  { %254 = vmatpush1.bf16.msra.mxu0 %v820_v33  ;;  %285 = vmatprep.mubr.bf16.mxu0 %v1024_v40  ;;  %v837_v46 = vld [vmem:[#allocation10 + $0x20] sm:$0xff]   ;;  %v839_v47 = vld [vmem:[#allocation10 + $0x28] sm:$0xff]   ;;  %v212_v53 = vrot.slane %v1198_v8, %v211_v51  ;;  %v834_v63 = vld [vmem:[#allocation12 + $0x10] sm:$0xff]   ;;  %vm669_vm5 = vcmask 15360  }
  0x87   :  { %746 = vmatprep.subr.bf16.mxu0 %v1022_v0  ;;  %v217_v55 = vrot.slane %v1198_v8, %v216_v52  ;;  %v830_v60 = vld [vmem:[#allocation12] sm:$0xff]   ;;  %v832_v62 = vld [vmem:[#allocation12 + $0x8] sm:$0xff]   ;;  %v836_v1 = vld [vmem:[#allocation12 + $0x18] sm:$0xff]   ;;  %v666_v52 = vsub.s32 6, %v1192_v6 }
  0x88   :  { %379 = vmatpush1.bf16.msra.mxu1 %v810_v26  ;;  %v838_v2 = vld [vmem:[#allocation12 + $0x20] sm:$0xff]   ;;  %v840_v3 = vld [vmem:[#allocation12 + $0x28] sm:$0xff]   ;;  %v647_v34 = vld [vmem:[%s1262_s7] sm:$0x3] }
  0x89   :  { %380 = vmatprep.subr.bf16.mxu1 %v811_v27 }
  0x8c   :  { %381 = vmatpush1.bf16.msra.mxu1 %v813_v28 }
  0x8d   :  { %382 = vmatprep.subr.bf16.mxu1 %v814_v29  ;;  %684 = vmatmul.mubr.msk.bf16.vlgmr.msra.gmra.mrb[4].mxu0 %vm249_vm3, %v129_v39  ;;  %v651_v39 = vrot.slane %v647_v34, %v136_v7  ;;  %v667_v7 = vrot.slane %v1198_v8, %v666_v52 }
  0x8e   :  { %762 = vmatprep.mubr.msk.bf16.mxu0 %vm1023_vm0, %v1022_v0  ;;  %747 = vmatpush3.bf16.msra.mxu0 %v829_v42 }
  0x8f   :  { %748 = vmatprep.subr.bf16.mxu0 %v1022_v0 }
  0x90   :  { %383 = vmatpush1.bf16.msra.mxu1 %v816_v30  ;;  %v447_v30 = vsub.s32 4, %v1192_v6 }
  0x91   :  { %384 = vmatprep.subr.bf16.mxu1 %v817_v31  ;;  %v556_v31 = vsub.s32 5, %v1192_v6 }
  0x92   :  { %749 = vmatpush3.bf16.msra.mxu0 %v831_v43 }
  0x93   :  { %750 = vmatprep.subr.bf16.mxu0 %v1022_v0  ;;  %v557_v33 = vrot.slane %v1198_v8, %v556_v31 }
  0x94   :  { %385 = vmatpush1.bf16.msra.mxu1 %v819_v32  ;;  %v448_v32 = vrot.slane %v1198_v8, %v447_v30 }
  0x95   :  { %386 = vmatprep.subr.bf16.mxu1 %v823_v35 }
  0x96   :  { %751 = vmatpush3.bf16.msra.mxu0 %v833_v44 }
  0x97   :  { %752 = vmatprep.subr.bf16.mxu0 %v1022_v0 }
  0x98   :  { %387 = vmatpush1.bf16.msra.mxu1 %v825_v36 }
  0x99   :  { %388 = vmatprep.subr.bf16.mxu1 %v826_v38 }
  0x9a   :  { %753 = vmatpush3.bf16.msra.mxu0 %v835_v45 }
  0x9b   :  { %754 = vmatprep.subr.bf16.mxu0 %v1022_v0 }
  0x9c   :  { %389 = vmatpush1.bf16.msra.mxu1 %v828_v41 }
  0x9d   :  { %766 = vmatprep.subr.bf16.mxu1 %v1022_v0 }
  0x9e   :  { %755 = vmatpush3.bf16.msra.mxu0 %v837_v46 }
  0x9f   :  { %756 = vmatprep.subr.bf16.mxu0 %v1022_v0 }
  0xa2   :  { %757 = vmatpush3.bf16.msra.mxu0 %v839_v47 }
  0xa3   :  { %758 = vmatprep.subr.bf16.mxu0 %v1022_v0 }
 0x158   :  { %v188_v10 = vpop.f32.mrb[0].mxu0 }
 0x159   :  { %v189_v11 = vadd.f32 %v188_v10, %v137_v9  ;;  %v744_v12 = vpop.f32.mrb[1].mxu0 }
 0x15a   :  { %v191_v13 = vpop.f32.mrb[2].mxu0  ;;  %v842_v12 = vld [vmem:[#allocation12 + $0x30] sm:$0xff]  }
 0x15b   :  { %v745_v14 = vpop.f32.mrb[3].mxu0  ;;  %194 = vadd.xlane.f32.xlu0 %v189_v11  ;;  %v843_v13 = vld [vmem:[#allocation10 + $0x38] sm:$0xff]  }
 0x15c   :  { %v844_v14 = vld [vmem:[#allocation12 + $0x38] sm:$0xff]  }
 0x160   :  { %v287_v4 = vpop.f32.mrb[4].mxu0 }
 0x161   :  { %v289_v5 = vpop.f32.mrb[5].mxu0 }
 0x162   :  { %v291_v9 = vpop.f32.mrb[6].mxu0 }
 0x163   :  { %v292_v10 = vpop.f32.mrb[7].mxu0 }
 0x1e8   :  { %v195_v16 = vpop.xlane.xlu0 %194 }
 0x1e9   :  { %v196_v17 = vmul.f32 0.03125, %v195_v16  ;;  %v125_v16 = vld [vmem:[%s1263_s8 + $0x8] sm:$0xff] }
 0x1eb   :  { %v197_v18 = vsub.f32 %v189_v11, %v196_v17  ;;  %v841_v11 = vld [vmem:[#allocation10 + $0x30] sm:$0xff]   ;;  %v418_v17 = vrot.slane %v1198_v8, %v417_v15 }
 0x1ec   :  { %759 = vmatpush3.bf16.msra.mxu0 %v841_v11 }
 0x1ed   :  { %v1203_v19 = vsel %vm200_vm2, %v197_v18, 0.0  ;;  %760 = vmatprep.subr.bf16.mxu0 %v1022_v0 }
 0x1ee   :  { %v202_v20 = vmul.f32 %v1203_v19, %v1203_v19 }
 0x1f0   :  { %203 = vadd.xlane.f32.xlu0 %v202_v20  ;;  %761 = vmatpush3.bf16.msra.mxu0 %v843_v13 }
 0x27d   :  { %v204_v48 = vpop.xlane.xlu0 %203 }
 0x27e   :  { %v205_v49 = vmul.f32 0.03125, %v204_v48 }
 0x280   :  { %v206_v50 = vadd.f32 1e-05, %v205_v49  ;;  %v658_v49 = vrot.slane %v647_v34, %v211_v51 }
 0x282   :  { %845 = vrsqrt.f32 %v206_v50 }
 0x28c   :  { %v846_v54 = vpop.eup %845 }
 0x28d   :  { %v208_v56 = vmul.f32 %v846_v54, %v1203_v19  ;;  %v422_v19 = vrot.slane %v125_v16, %v417_v15 }
 0x28f   :  { %v213_v57 = vmul.f32 %v212_v53, %v208_v56 }
 0x291   :  { %v218_v58 = vadd.f32 %v217_v55, %v213_v57 }
 0x293   :  { %v219_v59 = vpack.c.bf16 %v218_v58, %v218_v58 }
 0x295   :  { %847 = vtanh.bf16 %v219_v59 }
 0x2a0   :  { %v848_v61 = vpop.eup %847 }
 0x2a1   :  { %407 = vmatmul.mubr.bf16.vlgmr.msra.gmra.mrb[0].mxu1 %v848_v61 }
 0x2a2   :  { %767 = vmatpush3.bf16.msra.mxu1 %v830_v60  ;;  %782 = vmatprep.mubr.msk.bf16.mxu1 %vm1023_vm0, %v1022_v0 }
 0x2a3   :  { %768 = vmatprep.subr.bf16.mxu1 %v1022_v0 }
 0x2a6   :  { %769 = vmatpush3.bf16.msra.mxu1 %v832_v62 }
 0x2a7   :  { %770 = vmatprep.subr.bf16.mxu1 %v1022_v0 }
 0x2aa   :  { %771 = vmatpush3.bf16.msra.mxu1 %v834_v63 }
 0x2ab   :  { %772 = vmatprep.subr.bf16.mxu1 %v1022_v0 }
 0x2ae   :  { %773 = vmatpush3.bf16.msra.mxu1 %v836_v1 }
 0x2af   :  { %774 = vmatprep.subr.bf16.mxu1 %v1022_v0 }
 0x2b2   :  { %775 = vmatpush3.bf16.msra.mxu1 %v838_v2 }
 0x2b3   :  { %776 = vmatprep.subr.bf16.mxu1 %v1022_v0 }
 0x2b6   :  { %777 = vmatpush3.bf16.msra.mxu1 %v840_v3 }
 0x2b7   :  { %778 = vmatprep.subr.bf16.mxu1 %v1022_v0 }
 0x2ba   :  { %779 = vmatpush3.bf16.msra.mxu1 %v842_v12 }
 0x2bb   :  { %780 = vmatprep.subr.bf16.mxu1 %v1022_v0 }
 0x2be   :  { %781 = vmatpush3.bf16.msra.mxu1 %v844_v14 }
 0x374   :  { %v408_v18 = vpop.f32.mrb[0].mxu1 }
 0x375   :  { %v409_v20 = vadd.f32 %v408_v18, %v287_v4  ;;  %v410_v21 = vpop.f32.mrb[1].mxu1 }
 0x376   :  { %v411_v22 = vadd.f32 %v410_v21, %v289_v5  ;;  %v412_v23 = vpop.f32.mrb[2].mxu1 }
 0x377   :  { %v423_v24 = vadd.f32 %v418_v17, %v409_v20  ;;  %v413_v25 = vpop.f32.mrb[3].mxu1 }
 0x378   :  { %v424_v0 = vadd.f32 %v422_v19, %v411_v22 }
 0x379   :  { %v425_v26 = vmax.f32 %v423_v24, 0.0 }
 0x37a   :  { %v426_v27 = vmax.f32 %v424_v0, 0.0 }
 0x37b   :  { %v427_v28 = vpack.c.bf16 %v425_v26, %v425_v26 }
 0x37c   :  { %v428_v29 = vpack.c.bf16 %v426_v27, %v426_v27 }
 0x37d   :  { %763 = vmatmul.mubr.bf16.vlgmr.msra.gmra.mrb[8].mxu0 %v427_v28 }
 0x37e   :  { %783 = vmatmul.mubr.bf16.vlgmr.msra.gmra.mrb[4].mxu1 %v428_v29 }
 0x450   :  { %v531_v35 = vpop.f32.mrb[8].mxu0 }
 0x451   :  { %v532_v36 = vadd.f32 %v531_v35, %v448_v32  ;;  %v764_v37 = vpop.f32.mrb[9].mxu0  ;;  %v640_v38 = vpop.f32.mrb[4].mxu1 }
 0x452   :  { %v641_v40 = vadd.f32 %v640_v38, %v557_v33  ;;  %v534_v41 = vpop.f32.mrb[10].mxu0  ;;  %v784_v42 = vpop.f32.mrb[5].mxu1 }
 0x453   :  { %v537_v43 = vmax.f32 %v532_v36, 0.0  ;;  %v765_v44 = vpop.f32.mrb[11].mxu0  ;;  %v643_v45 = vpop.f32.mrb[6].mxu1 }
 0x454   :  { %v785_v46 = vpop.f32.mrb[7].mxu1  ;;  %v646_v47 = vmax.f32 %v641_v40, 0.0 }
 0x455   :  { %v652_v48 = vmul.f32 %v651_v39, %v537_v43 }
 0x456   :  { %v659_v50 = vmul.f32 %v658_v49, %v646_v47 }
 0x457   :  { %653 = vadd.xlane.f32.xlu1 %v652_v48 }
 0x45b   :  { %660 = vadd.xlane.f32.xlu1 %v659_v50 }
 0x4e4   :  { %v654_v53 = vpop.xlane.xlu1 %653 }
 0x4e8   :  { %v661_v54 = vpop.xlane.xlu1 %660 }
 0x4e9   :  { %v663_v55 = vsel %vm662_vm4, %v654_v53, %v661_v54 }
 0x4ea   :  { %v668_v56 = vadd.f32 %v667_v7, %v663_v55 }
 0x4ec   :  { %670 = vst.msk [vmem:[%s1264_s9] sm:$0xff] %vm669_vm5, %v668_v56 }
 0x4ed   :  { %675 = vsyncpa [#allocation3], 1 }
 0x4ee   :  { %676 = vsyncpa [#allocation5], 1 }
 0x4ef   :  { %677 = vsyncpa [#allocation8], 1 }
 0x4f0   :  { %678 = vsyncpa [#allocation11], 1 }

</bundles_post_ra>
